<compile_context>
chip_gen: v7x
topology: tpu7x:2x2x1
jax: 0.10.0
libtpu: 0.0.40
codegen_flags: <defaults>
</compile_context>

<pallas_src>
import jax
import jax.numpy as jnp
from jax.experimental import pallas as pl
from jax.experimental.pallas import tpu as pltpu


def _round_up(n, m):
    return ((n + m - 1) // m) * m


def _mlp_head_kernel(x_ref,
                     w1_ref, b1_ref,
                     w2_ref, b2_ref,
                     w3_ref, b3_ref,
                     w4_ref, b4_ref,
                     o_ref):
    """Fused fc1->relu->fc2->relu->fc3->relu->fc4 on one (TB, Cin) batch tile.

    Weights/biases are whole-array VMEM-resident. x arrives as f32 and is cast
    to the weight compute dtype (bf16) in-kernel; all matmuls accumulate in f32
    on the MXU. Dropout layers are identity (eval mode).
    """
    cdt = w1_ref.dtype

    # In-kernel f32 -> bf16 cast (VPU filler, hidden under the MXU).
    x = x_ref[...].astype(cdt)

    # fc1 + ReLU   (dropout1: identity in eval mode)
    h = jnp.dot(x, w1_ref[...], preferred_element_type=jnp.float32)
    h = jnp.maximum(h + b1_ref[...], 0.0).astype(cdt)

    # fc2 + ReLU   (dropout2: identity in eval mode)
    h = jnp.dot(h, w2_ref[...], preferred_element_type=jnp.float32)
    h = jnp.maximum(h + b2_ref[...], 0.0).astype(cdt)

    # fc3 + ReLU
    h = jnp.dot(h, w3_ref[...], preferred_element_type=jnp.float32)
    h = jnp.maximum(h + b3_ref[...], 0.0).astype(cdt)

    # fc4 (no activation); output block is lane-padded to a multiple of 128.
    out = jnp.dot(h, w4_ref[...], preferred_element_type=jnp.float32) + b4_ref[...]
    o_ref[...] = out.astype(o_ref.dtype)


def prepare_params(params, *, compute_dtype=jnp.bfloat16):
    """One-time parameter preparation (do this at model-setup, not per call).

    - weights -> compute_dtype (bf16: native MXU rate, half the resident bytes)
    - biases  -> f32 (added on the f32 accumulator)
    - w4/b4 lane-padded so the output tile is a multiple of 128 lanes
    """
    num_classes = params["w4"].shape[1]
    ncp = _round_up(num_classes, 128)

    w4, b4 = params["w4"], params["b4"]
    if ncp != num_classes:
        w4 = jnp.pad(w4, ((0, 0), (0, ncp - num_classes)))
        b4 = jnp.pad(b4, ((0, 0), (0, ncp - num_classes)))

    # TODO(synk): for v6e/v7x, optionally zero-pad in_channel (and in_channel//2)
    # to multiples of 256 here so every layer's K/N fills the 256x256 MXU.
    prepared = {
        "w1": params["w1"].astype(compute_dtype), "b1": params["b1"].astype(jnp.float32),
        "w2": params["w2"].astype(compute_dtype), "b2": params["b2"].astype(jnp.float32),
        "w3": params["w3"].astype(compute_dtype), "b3": params["b3"].astype(jnp.float32),
        "w4": w4.astype(compute_dtype),           "b4": b4.astype(jnp.float32),
        "num_classes": num_classes,
    }
    return prepared


def _pick_batch_tile(B, block_b):
    """Balanced batch tiles: minimal padding, sublane-aligned (8 rows of f32),
    and >=2 grid steps when B allows so both v7x TensorCores get work."""
    tiles = max(1, pl.cdiv(B, block_b))
    if tiles == 1 and B >= 16:
        tiles = 2                      # engage both TCs on v7x; no-op elsewhere
    tb = _round_up(pl.cdiv(B, tiles), 8)
    tiles = pl.cdiv(B, tb)
    return tb, tb * tiles, tiles


def classification_head(x, prepared, *, block_b=512):
    """x: (B, in_channel) f32. prepared: output of prepare_params().
    Returns (B, num_classes) f32."""
    B, cin = x.shape
    num_classes = prepared["num_classes"]
    ncp = prepared["w4"].shape[1]

    weights = (prepared["w1"], prepared["b1"],
               prepared["w2"], prepared["b2"],
               prepared["w3"], prepared["b3"],
               prepared["w4"], prepared["b4"])

    # ---- batch tiling -----------------------------------------------------
    tb, bp, _ = _pick_batch_tile(B, block_b)
    xp = x if bp == B else jnp.pad(x, ((0, bp - B), (0, 0)))

    # ---- VMEM budget (generation-aware) -----------------------------------
    # resident weights (single copy) + double-buffered I/O tiles + in-flight
    # intermediates (largest is the (tb, 2*cin) f32 accumulator + bf16 copy).
    resident_bytes = sum(int(a.size) * a.dtype.itemsize for a in weights)
    io_tile_bytes = 2 * (tb * cin * 4 + tb * ncp * 4)          # 2x = double buffer
    interm_bytes = 2 * tb * (2 * cin) * (4 + 2)                # f32 acc + bf16 act
    budget = resident_bytes + io_tile_bytes + interm_bytes + (4 << 20)
    try:
        vmem_cap = pltpu.get_tpu_info().vmem_capacity_bytes    # 64 MiB v7x, 128 MiB v5e/v6e
    except Exception:                                          # noqa: BLE001
        vmem_cap = 64 << 20                                    # conservative fallback
    vmem_limit = int(min(vmem_cap - (8 << 20), max(32 << 20, budget)))
    # TODO(synk): for very large in_channel (resident weights > ~60% of per-TC
    # VMEM, ~2.1k on v7x) add a K-reduction grid axis for fc1/fc2 (f32 VMEM
    # accumulator + pl.when init/finalize) or move w1/w2 to VMEM_SHARED.

    resident_spec = pl.BlockSpec(memory_space=pltpu.MemorySpace.VMEM)

    out = pl.pallas_call(
        _mlp_head_kernel,
        out_shape=jax.ShapeDtypeStruct((bp, ncp), jnp.float32),
        grid=(bp // tb,),
        in_specs=[pl.BlockSpec((tb, cin), lambda i: (i, 0))] + [resident_spec] * 8,
        out_specs=pl.BlockSpec((tb, ncp), lambda i: (i, 0)),
        compiler_params=pltpu.CompilerParams(
            dimension_semantics=("parallel",),  # megacore-shard batch tiles (v7x)
            vmem_limit_bytes=vmem_limit),
    )(xp, *weights)

    return out[:B, :num_classes]


def init_params(key, in_channel, num_classes):
    """Deterministic PyTorch-style (Kaiming-uniform-ish) Linear init.

    PyTorch nn.Linear stores weight as (out, in); we store transposed (in, out).
    """
    dims = [
        (in_channel, 2 * in_channel),       # fc1
        (2 * in_channel, in_channel),       # fc2
        (in_channel, in_channel // 2),      # fc3
        (in_channel // 2, num_classes),     # fc4
    ]
    params = {}
    for i, (fan_in, fan_out) in enumerate(dims, start=1):
        key, kw, kb = jax.random.split(key, 3)
        bound = 1.0 / jnp.sqrt(jnp.float32(fan_in))
        params[f"w{i}"] = jax.random.uniform(
            kw, (fan_in, fan_out), jnp.float32, -bound, bound)
        params[f"b{i}"] = jax.random.uniform(
            kb, (1, fan_out), jnp.float32, -bound, bound)
    return params


def reference_forward(x, params, compute_dtype=jnp.bfloat16):
    """Pure-JAX reference matching the kernel's numerics (bf16 ops, f32 accum)."""
    cdt = compute_dtype
    h = x.astype(cdt)
    h = jnp.dot(h, params["w1"].astype(cdt),
                preferred_element_type=jnp.float32) + params["b1"]
    h = jnp.maximum(h, 0.0).astype(cdt)
    h = jnp.dot(h, params["w2"].astype(cdt),
                preferred_element_type=jnp.float32) + params["b2"]
    h = jnp.maximum(h, 0.0).astype(cdt)
    h = jnp.dot(h, params["w3"].astype(cdt),
                preferred_element_type=jnp.float32) + params["b3"]
    h = jnp.maximum(h, 0.0).astype(cdt)
    return jnp.dot(h, params["w4"].astype(cdt),
                   preferred_element_type=jnp.float32) + params["b4"]


if __name__ == "__main__":
    B, in_channel, num_classes = 16, 32, 10

    key = jax.random.PRNGKey(0)
    key, kx = jax.random.split(key)
    x = jax.random.normal(kx, (B, in_channel), jnp.float32)
    params = init_params(key, in_channel, num_classes)

    prepared = prepare_params(params)            # one-time setup, not per call
    out = classification_head(x, prepared)
    out = jax.block_until_ready(out)

    ref = reference_forward(x, params)
    assert out.shape == (B, num_classes), out.shape
    # bf16 compute in both kernel and reference -> loose-ish tolerance.
    assert jnp.allclose(out, ref, atol=2e-2, rtol=2e-2), "mismatch vs reference"

    print("KERNEL_OK")
</pallas_src>

<mosaic_0001>
module attributes {stable_mosaic.version = 11 : i64} {
  func.func @_mlp_head_kernel(%arg0: i32, %arg1: memref<8x32xf32, #tpu.memory_space<vmem>>, %arg2: memref<32x64xbf16, #tpu.memory_space<vmem>>, %arg3: memref<1x64xf32, #tpu.memory_space<vmem>>, %arg4: memref<64x32xbf16, #tpu.memory_space<vmem>>, %arg5: memref<1x32xf32, #tpu.memory_space<vmem>>, %arg6: memref<32x16xbf16, #tpu.memory_space<vmem>>, %arg7: memref<1x16xf32, #tpu.memory_space<vmem>>, %arg8: memref<16x128xbf16, #tpu.memory_space<vmem>>, %arg9: memref<1x128xf32, #tpu.memory_space<vmem>>, %arg10: memref<8x128xf32, #tpu.memory_space<vmem>>) attributes {dimension_semantics = [#tpu.dimension_semantics<parallel>], iteration_bounds = array<i64: 2>, scalar_prefetch = 0 : i64, scratch_operands = 0 : i64, tpu.core_type = #tpu.core_type<tc>, window_params = [{transform_indices = @transform_0, window_bounds = array<i64: 8, 32>}, {pipeline_mode = #tpu.pipeline_mode<synchronous>, transform_indices = @transform_1, window_bounds = array<i64: 32, 64>}, {pipeline_mode = #tpu.pipeline_mode<synchronous>, transform_indices = @transform_2, window_bounds = array<i64: 1, 64>}, {pipeline_mode = #tpu.pipeline_mode<synchronous>, transform_indices = @transform_3, window_bounds = array<i64: 64, 32>}, {pipeline_mode = #tpu.pipeline_mode<synchronous>, transform_indices = @transform_4, window_bounds = array<i64: 1, 32>}, {pipeline_mode = #tpu.pipeline_mode<synchronous>, transform_indices = @transform_5, window_bounds = array<i64: 32, 16>}, {pipeline_mode = #tpu.pipeline_mode<synchronous>, transform_indices = @transform_6, window_bounds = array<i64: 1, 16>}, {pipeline_mode = #tpu.pipeline_mode<synchronous>, transform_indices = @transform_7, window_bounds = array<i64: 16, 128>}, {pipeline_mode = #tpu.pipeline_mode<synchronous>, transform_indices = @transform_8, window_bounds = array<i64: 1, 128>}, {transform_indices = @transform_9, window_bounds = array<i64: 8, 128>}]} {
    %c0 = arith.constant 0 : index
    %c0_0 = arith.constant 0 : index
    %0 = vector.load %arg1[%c0, %c0_0] : memref<8x32xf32, #tpu.memory_space<vmem>>, vector<8x32xf32>
    %1 = arith.truncf %0 : vector<8x32xf32> to vector<8x32xbf16>
    %c0_1 = arith.constant 0 : index
    %c0_2 = arith.constant 0 : index
    %2 = vector.load %arg2[%c0_1, %c0_2] : memref<32x64xbf16, #tpu.memory_space<vmem>>, vector<32x64xbf16>
    %cst = arith.constant dense<0.000000e+00> : vector<8x64xf32>
    %3 = tpu.matmul %1, %2, %cst {dimension_numbers = #tpu.dot_dimension_numbers<[1], [0], [0], [1], [0, 0, 1, 1], [], []>} : vector<8x32xbf16>, vector<32x64xbf16>, vector<8x64xf32> -> vector<8x64xf32>
    %c0_3 = arith.constant 0 : index
    %c0_4 = arith.constant 0 : index
    %4 = vector.load %arg3[%c0_3, %c0_4] : memref<1x64xf32, #tpu.memory_space<vmem>>, vector<1x64xf32>
    %5 = vector.broadcast %4 : vector<1x64xf32> to vector<8x64xf32>
    %6 = arith.addf %3, %5 : vector<8x64xf32>
    %cst_5 = arith.constant 0.000000e+00 : f32
    %7 = vector.broadcast %cst_5 : f32 to vector<8x64xf32>
    %8 = arith.maximumf %6, %7 : vector<8x64xf32>
    %9 = arith.truncf %8 : vector<8x64xf32> to vector<8x64xbf16>
    %c0_6 = arith.constant 0 : index
    %c0_7 = arith.constant 0 : index
    %10 = vector.load %arg4[%c0_6, %c0_7] : memref<64x32xbf16, #tpu.memory_space<vmem>>, vector<64x32xbf16>
    %cst_8 = arith.constant dense<0.000000e+00> : vector<8x32xf32>
    %11 = tpu.matmul %9, %10, %cst_8 {dimension_numbers = #tpu.dot_dimension_numbers<[1], [0], [0], [1], [0, 0, 1, 1], [], []>} : vector<8x64xbf16>, vector<64x32xbf16>, vector<8x32xf32> -> vector<8x32xf32>
    %c0_9 = arith.constant 0 : index
    %c0_10 = arith.constant 0 : index
    %12 = vector.load %arg5[%c0_9, %c0_10] : memref<1x32xf32, #tpu.memory_space<vmem>>, vector<1x32xf32>
    %13 = vector.broadcast %12 : vector<1x32xf32> to vector<8x32xf32>
    %14 = arith.addf %11, %13 : vector<8x32xf32>
    %cst_11 = arith.constant 0.000000e+00 : f32
    %15 = vector.broadcast %cst_11 : f32 to vector<8x32xf32>
    %16 = arith.maximumf %14, %15 : vector<8x32xf32>
    %17 = arith.truncf %16 : vector<8x32xf32> to vector<8x32xbf16>
    %c0_12 = arith.constant 0 : index
    %c0_13 = arith.constant 0 : index
    %18 = vector.load %arg6[%c0_12, %c0_13] : memref<32x16xbf16, #tpu.memory_space<vmem>>, vector<32x16xbf16>
    %cst_14 = arith.constant dense<0.000000e+00> : vector<8x16xf32>
    %19 = tpu.matmul %17, %18, %cst_14 {dimension_numbers = #tpu.dot_dimension_numbers<[1], [0], [0], [1], [0, 0, 1, 1], [], []>} : vector<8x32xbf16>, vector<32x16xbf16>, vector<8x16xf32> -> vector<8x16xf32>
    %c0_15 = arith.constant 0 : index
    %c0_16 = arith.constant 0 : index
    %20 = vector.load %arg7[%c0_15, %c0_16] : memref<1x16xf32, #tpu.memory_space<vmem>>, vector<1x16xf32>
    %21 = vector.broadcast %20 : vector<1x16xf32> to vector<8x16xf32>
    %22 = arith.addf %19, %21 : vector<8x16xf32>
    %cst_17 = arith.constant 0.000000e+00 : f32
    %23 = vector.broadcast %cst_17 : f32 to vector<8x16xf32>
    %24 = arith.maximumf %22, %23 : vector<8x16xf32>
    %25 = arith.truncf %24 : vector<8x16xf32> to vector<8x16xbf16>
    %c0_18 = arith.constant 0 : index
    %c0_19 = arith.constant 0 : index
    %26 = vector.load %arg8[%c0_18, %c0_19] : memref<16x128xbf16, #tpu.memory_space<vmem>>, vector<16x128xbf16>
    %cst_20 = arith.constant dense<0.000000e+00> : vector<8x128xf32>
    %27 = tpu.matmul %25, %26, %cst_20 {dimension_numbers = #tpu.dot_dimension_numbers<[1], [0], [0], [1], [0, 0, 1, 1], [], []>} : vector<8x16xbf16>, vector<16x128xbf16>, vector<8x128xf32> -> vector<8x128xf32>
    %c0_21 = arith.constant 0 : index
    %c0_22 = arith.constant 0 : index
    %28 = vector.load %arg9[%c0_21, %c0_22] : memref<1x128xf32, #tpu.memory_space<vmem>>, vector<1x128xf32>
    %29 = vector.broadcast %28 : vector<1x128xf32> to vector<8x128xf32>
    %30 = arith.addf %27, %29 : vector<8x128xf32>
    %c0_23 = arith.constant 0 : index
    %c0_24 = arith.constant 0 : index
    %31 = vector.load %arg10[%c0_23, %c0_24] : memref<8x128xf32, #tpu.memory_space<vmem>>, vector<8x128xf32>
    tpu.vector_store %arg10[%c0_23, %c0_24], %30 {strides = array<i32>} : memref<8x128xf32, #tpu.memory_space<vmem>>, vector<8x128xf32>,
    return
  }
  func.func @transform_0(%arg0: i32) -> (i32, i32) {
    %c0_i32 = arith.constant 0 : i32
    %c0_i32_0 = arith.constant 0 : i32
    return %arg0, %c0_i32 : i32, i32
  }
  func.func @transform_1(%arg0: i32) -> (i32, i32) {
    %c0_i32 = arith.constant 0 : i32
    %c0_i32_0 = arith.constant 0 : i32
    %c0_i32_1 = arith.constant 0 : i32
    return %c0_i32, %c0_i32_0 : i32, i32
  }
  func.func @transform_2(%arg0: i32) -> (i32, i32) {
    %c0_i32 = arith.constant 0 : i32
    %c0_i32_0 = arith.constant 0 : i32
    %c0_i32_1 = arith.constant 0 : i32
    return %c0_i32, %c0_i32_0 : i32, i32
  }
  func.func @transform_3(%arg0: i32) -> (i32, i32) {
    %c0_i32 = arith.constant 0 : i32
    %c0_i32_0 = arith.constant 0 : i32
    %c0_i32_1 = arith.constant 0 : i32
    return %c0_i32, %c0_i32_0 : i32, i32
  }
  func.func @transform_4(%arg0: i32) -> (i32, i32) {
    %c0_i32 = arith.constant 0 : i32
    %c0_i32_0 = arith.constant 0 : i32
    %c0_i32_1 = arith.constant 0 : i32
    return %c0_i32, %c0_i32_0 : i32, i32
  }
  func.func @transform_5(%arg0: i32) -> (i32, i32) {
    %c0_i32 = arith.constant 0 : i32
    %c0_i32_0 = arith.constant 0 : i32
    %c0_i32_1 = arith.constant 0 : i32
    return %c0_i32, %c0_i32_0 : i32, i32
  }
  func.func @transform_6(%arg0: i32) -> (i32, i32) {
    %c0_i32 = arith.constant 0 : i32
    %c0_i32_0 = arith.constant 0 : i32
    %c0_i32_1 = arith.constant 0 : i32
    return %c0_i32, %c0_i32_0 : i32, i32
  }
  func.func @transform_7(%arg0: i32) -> (i32, i32) {
    %c0_i32 = arith.constant 0 : i32
    %c0_i32_0 = arith.constant 0 : i32
    %c0_i32_1 = arith.constant 0 : i32
    return %c0_i32, %c0_i32_0 : i32, i32
  }
  func.func @transform_8(%arg0: i32) -> (i32, i32) {
    %c0_i32 = arith.constant 0 : i32
    %c0_i32_0 = arith.constant 0 : i32
    %c0_i32_1 = arith.constant 0 : i32
    return %c0_i32, %c0_i32_0 : i32, i32
  }
  func.func @transform_9(%arg0: i32) -> (i32, i32) {
    %c0_i32 = arith.constant 0 : i32
    %c0_i32_0 = arith.constant 0 : i32
    return %arg0, %c0_i32 : i32, i32
  }
}

</mosaic_0001>

<bundles_post_ra>
// kernel: tpu_custom_call.1
= control target key start
LH: loop header
LB: loop body
LE: loop exit
PB: predicated region body
PF: predicated region fallthrough
CT: control target
= control target key end

     0   :  { %14 = vsyncpa [#allocation3], 0  ;;  %s1072_s0 = inlined_call_operand.vmem [shape: f32[16,32], index: 0, kind: input, shape index: {}]   ;;  %s1073_s1 = inlined_call_operand.vmem [shape: bf16[32,64], index: 1, kind: input, shape index: {}]   ;;  %s1074_s2 = inlined_call_operand.vmem [shape: f32[1,64], index: 2, kind: input, shape index: {}]   ;;  %s1075_s3 = inlined_call_operand.vmem [shape: bf16[64,32], index: 3, kind: input, shape index: {}]   ;;  %s1076_s4 = inlined_call_operand.vmem [shape: f32[1,32], index: 4, kind: input, shape index: {}]   ;;  %s1077_s5 = inlined_call_operand.vmem [shape: bf16[32,16], index: 5, kind: input, shape index: {}]   ;;  %s1078_s6 = inlined_call_operand.vmem [shape: f32[1,16], index: 6, kind: input, shape index: {}]   ;;  %s1079_s7 = inlined_call_operand.vmem [shape: bf16[16,128], index: 7, kind: input, shape index: {}]   ;;  %s1080_s8 = inlined_call_operand.vmem [shape: f32[1,128], index: 8, kind: input, shape index: {}]   ;;  %s1081_s9 = inlined_call_operand.hbm [shape: f32[16,128], index: 9, kind: output, shape index: {}]  }
   0x1   :  { %16 = vsyncpa [#allocation3 + $0x1], 0  ;;  %s927_s30 = smov 0   ;;  %s929_s10 = smov 0  }
   0x2   :  { %s931_s11 = smov 0   ;;  %s933_s12 = smov 0  }
   0x3 LB: > { %s948_s13 = sadd.s32 4294967295, %s872_s12   ;;  %s686_s14 = sadd.s32 4294967294, %s872_s12   ;;  %s872_s12 = sphi %s933_s12, %s1087_s12   ;;  %s868_s11 = sphi %s931_s11, %s1086_s11   ;;  %s864_s10 = sphi %s929_s10, %s1085_s10   ;;  %s860_s30 = sphi %s927_s30, %s1084_s30  }
   0x4   : > { %s952_s15 = sadd.s32 1, %s872_s12   ;;  %s223_s16 = sadd.s32 1, %s868_s11 }
   0x5   : > { %s220_s17 = ssub.s32 %s872_s12, %s952_s15  ;;  %p233_p0 = scmp.ne.s32.totalorder %s868_s11, %s864_s10 }
   0x6   : > { %p221_p1 = scmp.eq.s32.totalorder %s220_s17, 0  ;;  %p234_p2 = scmp.eq.s32.totalorder %s948_s13, 1 }
   0x7   : > { %p239_p3 = scmp.ne.s32.totalorder %s864_s10, %s860_s30  ;;  %p240_p4 = scmp.eq.s32.totalorder %s686_s14, 1 }
   0x8   : > { %s963_s18 = scalar_select %p221_p1, %s868_s11, %s223_s16  }
   0x9   : > { %p965_p5 = por %p234_p2, %p233_p0  ;;  %p969_p6 = por %p240_p4, %p239_p3 }
   0xa   : > { %p689_p7 = scmp.ge.s32.totalorder %s872_s12, 1  ;;  %p289_p8 = scmp.lt.s32.totalorder %s872_s12, 3 }
   0xc   : > { %p290_p9 = pnand %p689_p7, %p289_p8 }
   0xd   : > { %v801_v0 = vld [vmem:[%s1073_s1] sm:$0xff] (!%p290_p9)   ;;  %v874_v1 = vmov (!%p290_p9), 0.0   ;;  %v802_v2 = vld [vmem:[%s1073_s1 + $0x8] sm:$0xff] (!%p290_p9)   ;;  %vm875_vm0 = vmmov (!%p290_p9), 0   ;;  %p324_p10 = scmp.lt.s32.totalorder (!%p290_p9), %s948_s13, 1  ;;  %vm354_vm1 = vcmask (!%p290_p9), 261120  }
   0xe   : > { %293 = sbr.rel (%p290_p9) target bundleno = 910 (0x38e), region = 56  ;;  %726 = vmatprep.subr.bf16.mxu0 (!%p290_p9), %v874_v1  ;;  %734 = vmatprep.subr.bf16.mxu1 (!%p290_p9), %v874_v1  ;;  %v803_v3 = vld [vmem:[%s1075_s3] sm:$0xff] (!%p290_p9)   ;;  %v804_v4 = vld [vmem:[%s1075_s3 + $0x8] sm:$0xff] (!%p290_p9)   ;;  %v805_v7 = vld [vmem:[%s1075_s3 + $0x10] sm:$0xff] (!%p290_p9)   ;;  %vm439_vm2 = vcmask (!%p290_p9), 523264   ;;  %vm568_vm3 = vcmask (!%p290_p9), 130048  }
   0xf   : > { %727 = vmatpush3.bf16.msra.mxu0 (!%p290_p9), %v801_v0  ;;  %730 = vmatprep.mubr.msk.bf16.mxu0 (!%p290_p9), %vm875_vm0, %v874_v1  ;;  %v806_v8 = vld [vmem:[%s1075_s3 + $0x18] sm:$0xff] (!%p290_p9)   ;;  %v807_v9 = vld [vmem:[%s1077_s5] sm:$0xff] (!%p290_p9)   ;;  %v808_v18 = vld [vmem:[%s1077_s5 + $0x8] sm:$0xff] (!%p290_p9)   ;;  %s321_s26 = sand.u32 (!%p290_p9), 1, %s864_s10   ;;  %s876_s25 = smov (!%p290_p9), [#allocation2]  }
  0x10   : > { %728 = vmatprep.subr.bf16.mxu0 (!%p290_p9), %v874_v1  ;;  %742 = vmatprep.mubr.msk.bf16.mxu1 (!%p290_p9), %vm875_vm0, %v874_v1  ;;  %v692_v10 = vld [vmem:[%s1074_s2] ss:$0 sm:$0xff] (!%p290_p9)  ;;  %s614_s24 = scalar_lea.sflag (!%p290_p9), [#allocation3], %s321_s26 }
  0x11   : > { %735 = vmatpush3.bf16.msra.mxu1 (!%p290_p9), %v803_v3  ;;  %v696_v19 = vld [vmem:[%s1076_s4] ss:$0 sm:$0xff] (!%p290_p9) }
  0x12   : > { %736 = vmatprep.subr.bf16.mxu1 (!%p290_p9), %v874_v1  ;;  %v809_v26 = vld [vmem:[%s1079_s7] sm:$0xff] (!%p290_p9)  }
  0x13   : > { %729 = vmatpush3.bf16.msra.mxu0 (!%p290_p9), %v802_v2  ;;  %v702_v28 = vld [vmem:[%s1078_s6] ss:$0 sm:$0xff] (!%p290_p9) }
  0x14   : > { %746 = vmatprep.subr.bf16.mxu0 (!%p290_p9), %v874_v1  ;;  %v706_v36 = vld [vmem:[%s1080_s8] ss:$0 sm:$0xff] (!%p290_p9) }
  0x15   : > { %s325_s27 = scalar_select %p324_p10, %s948_s13, 1  ;;  %737 = vmatpush3.bf16.msra.mxu1 %v804_v4 }
  0x16   : > { %738 = vmatprep.subr.bf16.mxu1 %v874_v1 }
  0x17   : > { %s691_s14 = sshll.u32 %s325_s27, 3  ;;  %s690_s27 = sshll.u32 %s321_s26, 3 }
  0x18   : > { %s327_s21 = scalar_lea.vmem %s1072_s0, %s691_s14  ;;  %s710_s14 = sshll.u32 %s948_s13, 7 }
  0x19   : > { %v329_v5 = vld [vmem:[%s327_s21] sm:$0xff]  ;;  %739 = vmatpush3.bf16.msra.mxu1 %v805_v7  ;;  %s323_s16 = scalar_lea.vmem [#allocation2], %s690_s27  ;;  %s1030_s23 = scalar_lea.hbm %s1081_s9, %s710_s14 }
  0x1a   : > { %v330_v6 = vpack.c.bf16 %v329_v5, %v329_v5  ;;  %740 = vmatprep.subr.bf16.mxu1 %v874_v1  ;;  %s627_s17 = sshll.u32 %s323_s16, 4  ;;  %s814_s27 = sshll.u32 %s876_s25, 4  ;;  %s1032_s17 = int_to_ptr.vmem [resolvable:$true] %s627_s17  ;;  %s815_s27 = int_to_ptr.vmem [resolvable:$false] %s814_s27 }
  0x1b   : > { %s810_s13 = scalar_lea.vmem %s1032_s17, 128  ;;  %s816_s28 = scalar_lea.vmem %s815_s27, 256 }
  0x1c   : > { %731 = vmatmul.mubr.msk.bf16.vlgmr.msra.gmra.mrb[0].mxu0 %vm354_vm1, %v330_v6  ;;  %p811_p11 = scmp.ne.s32.totalorder %s1032_s17, %s810_s13  ;;  %p817_p0 = scmp.lt.s32.totalorder %s1032_s17, %s815_s27 }
  0x1d   : > { %750 = vmatprep.mubr.msk.bf16.mxu0 %vm875_vm0, %v874_v1  ;;  %741 = vmatpush3.bf16.msra.mxu1 %v806_v8  ;;  %p818_p1 = scmp.lt.s32.totalorder %s816_s28, %s810_s13 }
  0x1e   : > { %747 = vmatpush3.bf16.msra.mxu0 %v807_v9  ;;  %p812_p12 = pnand %p811_p11, %p965_p5 }
  0x1f   : > { %748 = vmatprep.subr.bf16.mxu0 %v874_v1  ;;  %p819_p2 = por %p818_p1, %p817_p0 }
  0x20   : > { %p813_p13 = pneg %p812_p12 }
  0x22   : > { %749 = vmatpush3.bf16.msra.mxu0 %v808_v18  ;;  %p820_p3 = pnand %p819_p2, %p813_p13 }
  0x23   : > { %754 = vmatprep.subr.bf16.mxu0 %v874_v1 }
  0xef   : > { %v392_v11 = vpop.f32.mrb[0].mxu0 }
  0xf0   : > { %v393_v12 = vadd.f32 %v692_v10, %v392_v11  ;;  %v732_v13 = vpop.f32.mrb[1].mxu0 }
  0xf1   : > { %v395_v14 = vpop.f32.mrb[2].mxu0 }
  0xf2   : > { %v398_v15 = vmax.f32 %v393_v12, 0.0  ;;  %v733_v16 = vpop.f32.mrb[3].mxu0 }
  0xf4   : > { %v399_v17 = vpack.c.bf16 %v398_v15, %v398_v15 }
  0xf6   : > { %743 = vmatmul.mubr.msk.bf16.vlgmr.msra.gmra.mrb[0].mxu1 %vm439_vm2, %v399_v17 }
 0x1c9   : > { %v477_v20 = vpop.f32.mrb[0].mxu1 }
 0x1ca   : > { %v478_v21 = vadd.f32 %v696_v19, %v477_v20  ;;  %v744_v22 = vpop.f32.mrb[1].mxu1 }
 0x1cb   : > { %v480_v23 = vpop.f32.mrb[2].mxu1 }
 0x1cc   : > { %v483_v24 = vmax.f32 %v478_v21, 0.0  ;;  %v745_v25 = vpop.f32.mrb[3].mxu1 }
 0x1ce   : > { %v484_v27 = vpack.c.bf16 %v483_v24, %v483_v24 }
 0x1d0   : > { %751 = vmatmul.mubr.msk.bf16.vlgmr.msra.gmra.mrb[4].mxu0 %vm354_vm1, %v484_v27 }
 0x1d1   : > { %755 = vmatpush3.bf16.msra.mxu0 %v809_v26  ;;  %756 = vmatprep.mubr.msk.bf16.mxu0 %vm875_vm0, %v874_v1 }
 0x2a3   : > { %v545_v29 = vpop.f32.mrb[4].mxu0 }
 0x2a4   : > { %v546_v30 = vadd.f32 %v702_v28, %v545_v29  ;;  %v752_v31 = vpop.f32.mrb[5].mxu0 }
 0x2a5   : > { %v548_v32 = vpop.f32.mrb[6].mxu0 }
 0x2a6   : > { %v551_v33 = vmax.f32 %v546_v30, 0.0  ;;  %v753_v34 = vpop.f32.mrb[7].mxu0 }
 0x2a8   : > { %v552_v35 = vpack.c.bf16 %v551_v33, %v551_v33 }
 0x2aa   : > { %757 = vmatmul.mubr.msk.bf16.vlgmr.msra.gmra.mrb[8].mxu0 %vm568_vm3, %v552_v35 }
 0x37d   : > { %v606_v37 = vpop.f32.mrb[8].mxu0 }
 0x37e   : > { %v607_v38 = vadd.f32 %v706_v36, %v606_v37  ;;  %v758_v39 = vpop.f32.mrb[9].mxu0 }
 0x37f   : > { %v609_v40 = vpop.f32.mrb[10].mxu0 }
 0x380   : > { %612 = vst [vmem:[%s323_s16] sm:$0xff] %v607_v38  ;;  %v759_v41 = vpop.f32.mrb[11].mxu0 }
 0x381   : > { %823 = shalt.err (!%p820_p3)
}
 0x382   : > { %s824_s26 = scalar_lea.hbm %s1030_s23, 128  ;;  %s828_s16 = scalar_lea.hbm %s1081_s9, 256 }
 0x383   : > { %p825_p4 = scmp.ne.s32.totalorder %s1030_s23, %s824_s26  ;;  %p829_p9 = scmp.lt.u32.totalorder %s1030_s23, %s1081_s9 }
 0x384   : > { %p830_p10 = scmp.lt.u32.totalorder %s828_s16, %s824_s26  ;;  %p832_p12 = scmp.lt.u32.totalorder %s824_s26, %s1030_s23 }
 0x385   : > { %p826_p7 = pnand %p825_p4, %p965_p5 }
 0x386   : > { %p831_p11 = por %p830_p10, %p829_p9 }
 0x387   : > { %p827_p8 = pneg %p826_p7 }
 0x388   : > { %p833_p13 = por %p832_p12, %p831_p11 }
 0x38a   : > { %p834_p0 = pnand %p833_p13, %p827_p8 }
 0x38c   : > { %837 = shalt.err (!%p834_p0)
}
 0x38d   : > { %760 = dma.vmem_to_hbm [thread:$0]  (%p965_p5), %s1032_s17, 128, %s1030_s23, %s614_s24  }
 0x38e PF: > { %p766_p1 = scmp.ge.s32.totalorder %s872_s12, 2  ;;  %s639_s13 = sand.u32 1, %s860_s30  }
 0x38f   : > { %s640_s25 = scalar_lea.sflag [#allocation3], %s639_s13 }
 0x390   : > { %p763_p2 = pnand %p766_p1, %p969_p6 }
 0x392   : > { %855 = dma.done.wait (!%p763_p2), %s640_s25, 128  }
 0x393   : > { %857 = vsyncadd (!%p763_p2), %s640_s25, 4294967168  ;;  %p19_p3 = scmp.ge.s32.totalorder %s952_s15, 4   ;;  %s1084_s30 = smov %s864_s10 }
 0x394   : > { %s1085_s10 = smov %s868_s11  ;;  %s1086_s11 = smov %s963_s18 }
 0x395   : > { %s1087_s12 = smov %s952_s15  ;;  %21 = sbr.rel (!%p19_p3) target bundleno = 3 (0x3), region = 91 }
 0x39c   :  { %645 = vsyncpa [#allocation3], 1 }
 0x39d   :  { %647 = vsyncpa [#allocation3 + $0x1], 1 }

</bundles_post_ra>
